<compile_context>
chip_gen: v7x
topology: tpu7x:2x2x1
jax: 0.10.0
libtpu: 0.0.40
codegen_flags: <defaults>
</compile_context>

<pallas_src>
import jax
import jax.numpy as jnp
import numpy as np
from jax import lax
from jax.experimental import pallas as pl
from jax.experimental.pallas import tpu as pltpu


def _round_up(x, m):
    return ((x + m - 1) // m) * m


def _vmem_limit_bytes():
    """Per-generation scoped-VMEM budget: half of physical, capped at 64 MiB."""
    try:
        cap = int(pltpu.get_tpu_info().vmem_capacity_bytes)
    except Exception:
        cap = 64 * 1024 * 1024  # conservative fallback: v7x physical VMEM
    # v5e/v6e (128 MiB) -> 64 MiB limit; v7x (64 MiB) -> 32 MiB limit.
    return min(cap // 2, 64 * 1024 * 1024)


def _pick_block_cols(num_classes, n_pad, vmem_limit):
    """Target ~half of the VMEM budget for the double-buffered inputs,
    accumulator rows and in-kernel f32 temporaries."""
    per_col = 2 * (4 * num_classes + 4) + 8 + 8 * num_classes
    cols = (vmem_limit // 2) // per_col
    cols = min((cols // 128) * 128, 128 * 1024, n_pad)
    return max(128, cols)


def _make_kernel(num_classes, n_cells, block_cols, inner, has_tail):
    def kernel(logits_ref, tgt_ref, sum_ref, cnt_ref, sum_acc, cnt_acc):
        i = pl.program_id(1)

        @pl.when(i == 0)
        def _init():
            sum_acc[...] = jnp.zeros_like(sum_acc)
            cnt_acc[...] = jnp.zeros_like(cnt_acc)

        x = logits_ref[...].astype(jnp.float32)   # (C, TN)  classes on sublanes
        tgt = tgt_ref[...]                        # (1, TN)  int32, -1 == "no object"

        valid = tgt >= 0                          # obj mask folded into targets
        if has_tail:
            # Columns beyond n_cells (ragged tail / duplicated clamp block)
            # contain garbage or re-read data: force them invalid.
            start = (pl.program_id(0) * inner + i) * block_cols
            col = lax.broadcasted_iota(jnp.int32, (1, block_cols), 1) + start
            valid = jnp.logical_and(valid, col < n_cells)

        # Numerically stable log-sum-exp over the class (sublane) axis.
        row_max = jnp.max(x, axis=0, keepdims=True)                        # (1, TN)
        lse = row_max + jnp.log(
            jnp.sum(jnp.exp(x - row_max), axis=0, keepdims=True))          # (1, TN)

        # logits[cell, tgt[cell]] via one-hot select (no dynamic gather on TPU).
        # NOTE: class ids outside [0, C) silently pick 0.0 instead of raising
        # like PyTorch's CrossEntropyLoss would.
        cls = lax.broadcasted_iota(jnp.int32, (num_classes, block_cols), 0)
        picked = jnp.sum(jnp.where(cls == tgt, x, 0.0), axis=0, keepdims=True)

        ce = lse - picked
        valid_f = valid.astype(jnp.float32)
        if has_tail:
            # select (not multiply) squashes NaN/Inf from garbage tail columns.
            sum_acc[...] += jnp.where(valid, ce, 0.0)
        else:
            # No garbage columns can exist: mask is exactly 0/1 -> multiply.
            sum_acc[...] += valid_f * ce
        cnt_acc[...] += valid_f

        @pl.when(i == pl.num_programs(1) - 1)
        def _finalize():
            sum_ref[...] = jnp.sum(sum_acc[...], keepdims=True)
            cnt_ref[...] = jnp.sum(cnt_acc[...], keepdims=True)

    return kernel


@jax.jit
def class_loss(obj, predictions, target):
    """JAX/Pallas equivalent of ClassLoss.forward(obj, predictions, target)."""
    ch = predictions.shape[-1]
    num_classes = ch - 5
    n = int(np.prod(predictions.shape[:-1]))

    # Lane-dense re-layout: classes on sublanes, cells on lanes.
    logits_t = predictions.reshape(n, ch)[:, 5:].T                          # (C, N)
    cls_ids = target.reshape(n, target.shape[-1])[:, 5].astype(jnp.int32)   # (N,)
    # Fold obj into the target stream: -1 marks "not an object cell".
    tgt = jnp.where(obj.reshape(n), cls_ids, -1).astype(jnp.int32).reshape(1, n)

    # Pad the lane axis to a multiple of 128 only when needed (<=127 columns).
    n_pad = _round_up(n, 128)
    if n_pad != n:
        logits_t = jnp.pad(logits_t, ((0, 0), (0, n_pad - n)))
        tgt = jnp.pad(tgt, ((0, 0), (0, n_pad - n)), constant_values=-1)

    vmem_limit = _vmem_limit_bytes()
    block_cols = _pick_block_cols(num_classes, n_pad, vmem_limit)
    total_blocks = pl.cdiv(n_pad, block_cols)

    # Unconditional 2-way slice whenever there is more than one block so v7x's
    # two TensorCores each take half; on 1-core chips it is a serial outer loop.
    num_slices = 2 if total_blocks >= 2 else 1
    inner = pl.cdiv(total_blocks, num_slices)
    has_tail = (num_slices * inner * block_cols) != n

    kernel = _make_kernel(num_classes, n, block_cols, inner, has_tail)

    last_block = total_blocks - 1
    if num_slices * inner > total_blocks:
        # Odd block count: clamp the one extra block onto the last real block;
        # the in-kernel column guard masks its contribution to zero.
        col_map = lambda o, i: (0, jnp.minimum(o * inner + i, last_block))
    else:
        col_map = lambda o, i: (0, o * inner + i)

    loss_sum, cnt = pl.pallas_call(
        kernel,
        out_shape=(
            jax.ShapeDtypeStruct((num_slices, 1), jnp.float32),
            jax.ShapeDtypeStruct((num_slices, 1), jnp.float32),
        ),
        grid=(num_slices, inner),
        in_specs=[
            pl.BlockSpec((num_classes, block_cols), col_map),
            pl.BlockSpec((1, block_cols), col_map),
        ],
        out_specs=(
            pl.BlockSpec((1, 1), lambda o, i: (o, 0)),
            pl.BlockSpec((1, 1), lambda o, i: (o, 0)),
        ),
        scratch_shapes=[
            pltpu.VMEM((1, block_cols), jnp.float32),
            pltpu.VMEM((1, block_cols), jnp.float32),
        ],
        compiler_params=pltpu.CompilerParams(
            dimension_semantics=("parallel", "arbitrary"),
            vmem_limit_bytes=vmem_limit,
            allow_input_fusion=[True, True],
        ),
        cost_estimate=pl.CostEstimate(
            flops=6 * n * num_classes,
            transcendentals=n * (num_classes + 1),
            bytes_accessed=4 * n * num_classes + 4 * n + 8 * num_slices,
        ),
    )(logits_t, tgt)

    # Mean over the obj-masked cells (NaN if no objects, matching PyTorch).
    return jnp.sum(loss_sum) / jnp.sum(cnt)


def _reference_class_loss(obj, predictions, target):
    """Pure numpy reference matching nn.CrossEntropyLoss semantics."""
    obj = np.asarray(obj)
    predictions = np.asarray(predictions, dtype=np.float64)
    target = np.asarray(target, dtype=np.float64)

    logits = predictions[..., 5:][obj]              # [N_obj, C]
    labels = target[..., 5][obj].astype(np.int64)   # [N_obj]

    m = logits.max(axis=-1, keepdims=True)
    lse = m[:, 0] + np.log(np.exp(logits - m).sum(axis=-1))
    picked = logits[np.arange(logits.shape[0]), labels]
    return float(np.mean(lse - picked))


if __name__ == "__main__":
    key = jax.random.PRNGKey(0)
    k1, k2, k3 = jax.random.split(key, 3)

    B, A, S, C = 2, 3, 8, 4          # batch, anchors, grid size, num classes
    pred_shape = (B, A, S, S, 5 + C)
    tgt_shape = (B, A, S, S, 6)

    predictions = jax.random.normal(k1, pred_shape, dtype=jnp.float32)

    # target[..., 5] holds integer class ids in [0, C)
    class_ids = jax.random.randint(k2, (B, A, S, S), 0, C).astype(jnp.float32)
    target = jnp.zeros(tgt_shape, dtype=jnp.float32)
    target = target.at[..., 5].set(class_ids)

    # obj mask with at least one positive cell
    obj = jax.random.bernoulli(k3, p=0.25, shape=(B, A, S, S))
    obj = obj.at[0, 0, 0, 0].set(True)

    loss = class_loss(obj, predictions, target)
    loss = jax.block_until_ready(loss)

    ref = _reference_class_loss(obj, predictions, target)
    if not np.allclose(float(loss), ref, rtol=1e-5, atol=1e-5):
        raise AssertionError(f"mismatch: pallas={float(loss)} ref={ref}")

    print("KERNEL_OK")
</pallas_src>

<mosaic_0001>
module attributes {stable_mosaic.version = 11 : i64} {
  func.func @kernel(%arg0: i32, %arg1: i32, %arg2: memref<4x384xf32, #tpu.memory_space<vmem>>, %arg3: memref<1x384xi32, #tpu.memory_space<vmem>>, %arg4: memref<1x1xf32, #tpu.memory_space<vmem>>, %arg5: memref<1x1xf32, #tpu.memory_space<vmem>>, %arg6: memref<1x384xf32, #tpu.memory_space<vmem>>, %arg7: memref<1x384xf32, #tpu.memory_space<vmem>>) attributes {dimension_semantics = [#tpu.dimension_semantics<parallel>, #tpu.dimension_semantics<arbitrary>], iteration_bounds = array<i64: 1, 1>, scalar_prefetch = 0 : i64, scratch_operands = 2 : i64, tpu.core_type = #tpu.core_type<tc>, window_params = [{transform_indices = @transform_0, window_bounds = array<i64: 4, 384>}, {transform_indices = @transform_1, window_bounds = array<i64: 1, 384>}, {transform_indices = @transform_2, window_bounds = array<i64: 1, 1>}, {transform_indices = @transform_3, window_bounds = array<i64: 1, 1>}]} {
    %c0_i32 = arith.constant 0 : i32
    %0 = arith.cmpi eq, %arg1, %c0_i32 : i32
    %1 = arith.extui %0 : i1 to i32
    %c0_i32_0 = arith.constant 0 : i32
    %2 = arith.cmpi ne, %1, %c0_i32_0 : i32
    scf.if %2 {
      %cst_18 = arith.constant 0.000000e+00 : f32
      %36 = vector.broadcast %cst_18 : f32 to vector<1x384xf32>
      %c0_19 = arith.constant 0 : index
      %c0_20 = arith.constant 0 : index
      %37 = vector.load %arg6[%c0_19, %c0_20] : memref<1x384xf32, #tpu.memory_space<vmem>>, vector<1x384xf32>
      tpu.vector_store %arg6[%c0_19, %c0_20], %36 {strides = array<i32>} : memref<1x384xf32, #tpu.memory_space<vmem>>, vector<1x384xf32>,
      %cst_21 = arith.constant 0.000000e+00 : f32
      %38 = vector.broadcast %cst_21 : f32 to vector<1x384xf32>
      %c0_22 = arith.constant 0 : index
      %c0_23 = arith.constant 0 : index
      %39 = vector.load %arg7[%c0_22, %c0_23] : memref<1x384xf32, #tpu.memory_space<vmem>>, vector<1x384xf32>
      tpu.vector_store %arg7[%c0_22, %c0_23], %38 {strides = array<i32>} : memref<1x384xf32, #tpu.memory_space<vmem>>, vector<1x384xf32>,
    } else {
    }
    %c0 = arith.constant 0 : index
    %c0_1 = arith.constant 0 : index
    %3 = vector.load %arg2[%c0, %c0_1] : memref<4x384xf32, #tpu.memory_space<vmem>>, vector<4x384xf32>
    %c0_2 = arith.constant 0 : index
    %c0_3 = arith.constant 0 : index
    %4 = vector.load %arg3[%c0_2, %c0_3] : memref<1x384xi32, #tpu.memory_space<vmem>>, vector<1x384xi32>
    %c0_i32_4 = arith.constant 0 : i32
    %5 = vector.broadcast %c0_i32_4 : i32 to vector<1x384xi32>
    %6 = arith.cmpi sge, %4, %5 : vector<1x384xi32>
    %cst = arith.constant dense<0xFF800000> : vector<384xf32>
    %7 = vector.multi_reduction <maximumf>, %3, %cst [0] : vector<4x384xf32> to vector<384xf32>
    %8 = vector.shape_cast %7 : vector<384xf32> to vector<1x384xf32>
    %9 = vector.broadcast %8 : vector<1x384xf32> to vector<4x384xf32>
    %10 = arith.subf %3, %9 : vector<4x384xf32>
    %11 = math.exp %10 : vector<4x384xf32>
    %cst_5 = arith.constant dense<0.000000e+00> : vector<384xf32>
    %12 = vector.multi_reduction <add>, %11, %cst_5 [0] : vector<4x384xf32> to vector<384xf32>
    %13 = vector.shape_cast %12 : vector<384xf32> to vector<1x384xf32>
    %14 = math.log %13 : vector<1x384xf32>
    %15 = arith.addf %8, %14 : vector<1x384xf32>
    %16 = tpu.iota {dimensions = array<i32: 0>} : vector<4x384xi32>
    %17 = vector.broadcast %4 : vector<1x384xi32> to vector<4x384xi32>
    %18 = arith.cmpi eq, %16, %17 : vector<4x384xi32>
    %cst_6 = arith.constant 0.000000e+00 : f32
    %19 = vector.broadcast %cst_6 : f32 to vector<4x384xf32>
    %20 = arith.select %18, %3, %19 : vector<4x384xi1>, vector<4x384xf32>
    %cst_7 = arith.constant dense<0.000000e+00> : vector<384xf32>
    %21 = vector.multi_reduction <add>, %20, %cst_7 [0] : vector<4x384xf32> to vector<384xf32>
    %22 = vector.shape_cast %21 : vector<384xf32> to vector<1x384xf32>
    %23 = arith.subf %15, %22 : vector<1x384xf32>
    %24 = arith.extui %6 : vector<1x384xi1> to vector<1x384xi32>
    %25 = arith.sitofp %24 : vector<1x384xi32> to vector<1x384xf32>
    %c0_8 = arith.constant 0 : index
    %c0_9 = arith.constant 0 : index
    %26 = vector.load %arg6[%c0_8, %c0_9] : memref<1x384xf32, #tpu.memory_space<vmem>>, vector<1x384xf32>
    %27 = arith.mulf %25, %23 : vector<1x384xf32>
    %28 = arith.addf %26, %27 : vector<1x384xf32>
    %c0_10 = arith.constant 0 : index
    %c0_11 = arith.constant 0 : index
    %29 = vector.load %arg6[%c0_10, %c0_11] : memref<1x384xf32, #tpu.memory_space<vmem>>, vector<1x384xf32>
    tpu.vector_store %arg6[%c0_10, %c0_11], %28 {strides = array<i32>} : memref<1x384xf32, #tpu.memory_space<vmem>>, vector<1x384xf32>,
    %c0_12 = arith.constant 0 : index
    %c0_13 = arith.constant 0 : index
    %30 = vector.load %arg7[%c0_12, %c0_13] : memref<1x384xf32, #tpu.memory_space<vmem>>, vector<1x384xf32>
    %31 = arith.addf %30, %25 : vector<1x384xf32>
    %c0_14 = arith.constant 0 : index
    %c0_15 = arith.constant 0 : index
    %32 = vector.load %arg7[%c0_14, %c0_15] : memref<1x384xf32, #tpu.memory_space<vmem>>, vector<1x384xf32>
    tpu.vector_store %arg7[%c0_14, %c0_15], %31 {strides = array<i32>} : memref<1x384xf32, #tpu.memory_space<vmem>>, vector<1x384xf32>,
    %c0_i32_16 = arith.constant 0 : i32
    %33 = arith.cmpi eq, %arg1, %c0_i32_16 : i32
    %34 = arith.extui %33 : i1 to i32
    %c0_i32_17 = arith.constant 0 : i32
    %35 = arith.cmpi ne, %34, %c0_i32_17 : i32
    scf.if %35 {
      %c0_18 = arith.constant 0 : index
      %c0_19 = arith.constant 0 : index
      %36 = vector.load %arg6[%c0_18, %c0_19] : memref<1x384xf32, #tpu.memory_space<vmem>>, vector<1x384xf32>
      %37 = vector.shape_cast %36 : vector<1x384xf32> to vector<1x1x384xf32>
      %cst_20 = arith.constant dense<0.000000e+00> : vector<1xf32>
      %38 = vector.multi_reduction <add>, %37, %cst_20 [1, 2] : vector<1x1x384xf32> to vector<1xf32>
      %39 = vector.shape_cast %38 : vector<1xf32> to vector<1x1x1xf32>
      %40 = vector.extract %39[0, 0, 0] : f32 from vector<1x1x1xf32>
      %41 = vector.broadcast %40 : f32 to vector<1x1xf32>
      %c0_21 = arith.constant 0 : index
      %c0_22 = arith.constant 0 : index
      %42 = vector.load %arg4[%c0_21, %c0_22] : memref<1x1xf32, #tpu.memory_space<vmem>>, vector<1x1xf32>
      tpu.vector_store %arg4[%c0_21, %c0_22], %41 {strides = array<i32>} : memref<1x1xf32, #tpu.memory_space<vmem>>, vector<1x1xf32>,
      %c0_23 = arith.constant 0 : index
      %c0_24 = arith.constant 0 : index
      %43 = vector.load %arg7[%c0_23, %c0_24] : memref<1x384xf32, #tpu.memory_space<vmem>>, vector<1x384xf32>
      %44 = vector.shape_cast %43 : vector<1x384xf32> to vector<1x1x384xf32>
      %cst_25 = arith.constant dense<0.000000e+00> : vector<1xf32>
      %45 = vector.multi_reduction <add>, %44, %cst_25 [1, 2] : vector<1x1x384xf32> to vector<1xf32>
      %46 = vector.shape_cast %45 : vector<1xf32> to vector<1x1x1xf32>
      %47 = vector.extract %46[0, 0, 0] : f32 from vector<1x1x1xf32>
      %48 = vector.broadcast %47 : f32 to vector<1x1xf32>
      %c0_26 = arith.constant 0 : index
      %c0_27 = arith.constant 0 : index
      %49 = vector.load %arg5[%c0_26, %c0_27] : memref<1x1xf32, #tpu.memory_space<vmem>>, vector<1x1xf32>
      tpu.vector_store %arg5[%c0_26, %c0_27], %48 {strides = array<i32>} : memref<1x1xf32, #tpu.memory_space<vmem>>, vector<1x1xf32>,
    } else {
    }
    return
  }
  func.func @transform_0(%arg0: i32, %arg1: i32) -> (i32, i32) {
    %c1_i32 = arith.constant 1 : i32
    %0 = arith.muli %arg0, %c1_i32 : i32
    %1 = arith.addi %0, %arg1 : i32
    %c0_i32 = arith.constant 0 : i32
    %c0_i32_0 = arith.constant 0 : i32
    return %c0_i32, %1 : i32, i32
  }
  func.func @transform_1(%arg0: i32, %arg1: i32) -> (i32, i32) {
    %c1_i32 = arith.constant 1 : i32
    %0 = arith.muli %arg0, %c1_i32 : i32
    %1 = arith.addi %0, %arg1 : i32
    %c0_i32 = arith.constant 0 : i32
    %c0_i32_0 = arith.constant 0 : i32
    return %c0_i32, %1 : i32, i32
  }
  func.func @transform_2(%arg0: i32, %arg1: i32) -> (i32, i32) {
    %c0_i32 = arith.constant 0 : i32
    %c0_i32_0 = arith.constant 0 : i32
    return %arg0, %c0_i32 : i32, i32
  }
  func.func @transform_3(%arg0: i32, %arg1: i32) -> (i32, i32) {
    %c0_i32 = arith.constant 0 : i32
    %c0_i32_0 = arith.constant 0 : i32
    return %arg0, %c0_i32 : i32, i32
  }
}

</mosaic_0001>

<bundles_post_ra>
// kernel: class_loss.2
= control target key start
LH: loop header
LB: loop body
LE: loop exit
PB: predicated region body
PF: predicated region fallthrough
CT: control target
= control target key end

     0   :  { %s694_s0 = inlined_call_operand.vmem [shape: f32[384,4], index: 0, kind: input, shape index: {}]   ;;  %s695_s1 = inlined_call_operand.vmem [shape: pred[1,384], index: 1, kind: input, shape index: {}]   ;;  %s696_s2 = inlined_call_operand.vmem [shape: f32[384,6], index: 2, kind: input, shape index: {}]   ;;  %s697_s3 = inlined_call_operand.<no memory space> [shape: s32[], index: 3, kind: input, shape index: {}]   ;;  %s698_s4 = inlined_call_operand.hbm [shape: f32[1,1], index: 4, kind: output, shape index: {0}]   ;;  %s699_s5 = inlined_call_operand.hbm [shape: f32[1,1], index: 5, kind: output, shape index: {1}]  }
   0x1   :  { %v11_v0 = vstv %s697_s3 }
   0x2   :  { %12 = vsyncpa [#allocation10], 0  ;;  %v85_v1 = vld [vmem:[%s694_s0] sm:$0xff]   ;;  %v445_v2 = vld [vmem:[%s694_s0 + $0x8] sm:$0xf]  ;;  %vm104_vm0 = vcmask 1044480   ;;  %v168_v10 = vlaneseq }
   0x3   :  { %v98_v3 = vld [vmem:[%s695_s1] ss:$0 sm:$0xf]  ;;  %87 = vst [vmem:[#allocation13] sm:$0xff] %v85_v1   ;;  %97 = vst [vmem:[#allocation13 + $0x8] sm:$0xf] %v445_v2 }
   0x4   :  { %v103_v4 = vld [vmem:[%s696_s2] sm:$0x3f]  ;;  %v99_v6 = vunpack.c.0.s8 %v98_v3  ;;  %v447_v8 = vld [vmem:[%s696_s2 + $0x8] sm:$0x3f]  ;;  %v449_v14 = vld [vmem:[%s696_s2 + $0x10] sm:$0x3f] }
   0x5   :  { %v446_v5 = vld [vmem:[%s695_s1 + $0x1] ss:$0 sm:$0xf]  ;;  %v105_v7 = vsel %vm104_vm0, 0, %v103_v4  ;;  %v127_v13 = vsel %vm104_vm0, 0, %v447_v8  ;;  %v150_v17 = vsel %vm104_vm0, 0, %v449_v14 }
   0x6   :  { %v448_v9 = vld [vmem:[%s695_s1 + $0x2] ss:$0 sm:$0xf]  ;;  %v106_v11 = vrot.slane %v105_v7, 5  ;;  %v120_v12 = vunpack.c.0.s8 %v446_v5  ;;  %v128_v15 = vrot.slane %v127_v13, 5  ;;  %vm585_vm1 = vcmp.lt.s32.totalorder %v168_v10, 384 }
   0x7   :  { %v143_v16 = vunpack.c.0.s8 %v448_v9 }
   0x8   :  { %13 = vsyncpa [#allocation12], 0  ;;  %v451_v19 = vtrunc.f32 %v106_v11  ;;  %v151_v20 = vrot.slane %v150_v17, 5  ;;  %vm113_vm2 = vcmp.ne.s32.totalorder %v99_v6, 0  ;;  %v453_v21 = vtrunc.f32 %v128_v15  ;;  %s526_s1 = smov [#allocation9]   ;;  %s527_s10 = smov [#allocation11]  }
   0x9   :  { %v524_v22 = vmov 0.0   ;;  %vm181_vm3 = vcmask 1043456   ;;  %vm135_vm4 = vcmp.ne.s32.totalorder %v120_v12, 0  ;;  %vm158_vm5 = vcmp.ne.s32.totalorder %v143_v16, 0  ;;  %s407_s2 = sshll.u32 %s526_s1, 4  ;;  %s417_s11 = sshll.u32 %s527_s10, 4  ;;  %s408_s2 = int_to_ptr.vmem [resolvable:$true] %s407_s2  ;;  %s418_s11 = int_to_ptr.vmem [resolvable:$true] %s417_s11 }
   0xa   :  { %172 = vst.msk [vmem:[#allocation2] sm:$0x7] %vm585_vm1, %v524_v22  ;;  %173 = vst.msk [vmem:[#allocation3] sm:$0x7] %vm585_vm1, %v524_v22  ;;  %v452_v23 = vcvt.f32.s32 %v451_v19  ;;  %v455_v24 = vtrunc.f32 %v151_v20  ;;  %v454_v25 = vcvt.f32.s32 %v453_v21  ;;  %v593_v26 = vld [vmem:[#allocation13] sm:$0xff]  ;;  %v620_v60 = vshrl.u32 %v168_v10, 7  ;;  %p481_p1 = scmp.lt.s32.totalorder %s408_s2, %s408_s2 }
   0xb   :  { %v595_v27 = vld [vmem:[#allocation13 + $0x8] sm:$0xf]  ;;  %v599_v30 = vcombine.high %v593_v26, %v593_v26  ;;  %v182_v31 = vsel %vm181_vm3, %v593_v26, -inf  ;;  %vm350_vm10 = vcmask 1040384   ;;  %vm366_vm11 = vcmask 0   ;;  %s476_s12 = scalar_lea.vmem %s408_s2, 16 }
   0xc   :  { %v114_v28 = vsel %vm113_vm2, %v452_v23, %v11_v0  ;;  %v456_v29 = vcvt.f32.s32 %v455_v24  ;;  %v136_v32 = vsel %vm135_vm4, %v454_v25, %v11_v0  ;;  %v183_v33 = vrot.slane %v182_v31, 4  ;;  %p477_p0 = scmp.ne.s32.totalorder %s408_s2, %s476_s12  ;;  %s480_s13 = scalar_lea.vmem %s408_s2, 32 }
   0xd   :  { %117 = vst [vmem:[#allocation14] sm:$0x1] %v114_v28  ;;  %v196_v34 = vsel %vm181_vm3, %v595_v27, -inf  ;;  %140 = vst [vmem:[#allocation14 + $0x1] sm:$0x1] %v136_v32  ;;  %v189_v36 = vsel %vm181_vm3, %v599_v30, -inf  ;;  %p482_p2 = scmp.lt.s32.totalorder %s480_s13, %s476_s12 }
   0xe   :  { %v159_v35 = vsel %vm158_vm5, %v456_v29, %v11_v0  ;;  %v197_v37 = vrot.slane %v196_v34, 4  ;;  %v184_v38 = vmax.f32 %v182_v31, %v183_v33  ;;  %v190_v39 = vrot.slane %v189_v36, 4 }
   0xf   :  { %163 = vst [vmem:[#allocation14 + $0x2] sm:$0x1] %v159_v35  ;;  %v626_v0 = vsub.s32 0, %v620_v60  ;;  %v629_v1 = vsub.s32 2, %v620_v60  ;;  %v632_v2 = vsub.s32 1, %v620_v60  ;;  %p483_p3 = por %p482_p2, %p481_p1 }
  0x10   :  { %v198_v40 = vmax.f32 %v196_v34, %v197_v37  ;;  %v185_v41 = vrot.slane %v184_v38, 2  ;;  %v191_v42 = vmax.f32 %v189_v36, %v190_v39 }
  0x11   :  { %v327_v51 = vld [vmem:[#allocation3] sm:$0x7]  ;;  %p484_p4 = pnand %p483_p3, %p477_p0 }
  0x12   :  { %v199_v43 = vrot.slane %v198_v40, 2  ;;  %v186_v44 = vmax.f32 %v184_v38, %v185_v41  ;;  %v192_v45 = vrot.slane %v191_v42, 2 }
  0x14   :  { %v200_v46 = vmax.f32 %v198_v40, %v199_v43  ;;  %v187_v47 = vrot.slane %v186_v44, 1  ;;  %v193_v48 = vmax.f32 %v191_v42, %v192_v45 }
  0x16   :  { %v176_v49 = vld [vmem:[#allocation14] sm:$0x7]  ;;  %v201_v50 = vrot.slane %v200_v46, 1  ;;  %v607_v52 = vmax.f32 %v186_v44, %v187_v47  ;;  %v194_v53 = vrot.slane %v193_v48, 1 }
  0x17   :  { %vm177_vm6 = vcmp.ge.s32.totalorder %v176_v49, 0  ;;  %v251_v3 = vrot.slane %v176_v49, %v626_v0  ;;  %v259_v4 = vrot.slane %v176_v49, %v629_v1  ;;  %v255_v5 = vrot.slane %v176_v49, %v632_v2 }
  0x18   :  { %v609_v54 = vmax.f32 %v200_v46, %v201_v50  ;;  %v611_v55 = vsel %vm177_vm6, 1.0, %v524_v22  ;;  %v613_v56 = vmax.f32 %v193_v48, %v194_v53  ;;  %v525_v50 = vmov 1966171168  }
  0x19   :  { %v328_v57 = vadd.f32 %v611_v55, %v327_v51  ;;  %vm260_vm7 = vcmp.eq.s32.totalorder %v620_v60, %v251_v3  ;;  %vm262_vm8 = vcmp.eq.s32.totalorder %v620_v60, %v259_v4  ;;  %vm641_vm9 = vcmp.eq.s32.totalorder %v620_v60, %v255_v5 }
  0x1a   :  { %v208_v58 = vsub.f32 %v595_v27, %v609_v54  ;;  %v205_v59 = vcombine.low %v607_v52, %v613_v56  ;;  %v263_v10 = vsel %vm260_vm7, %v593_v26, 0.0  ;;  %v265_v11 = vsel %vm262_vm8, %v595_v27, 0.0 }
  0x1b   :  { %329 = vst.msk [vmem:[#allocation3] sm:$0x7] %vm585_vm1, %v328_v57  ;;  %v264_v16 = vsel %vm641_vm9, %v599_v30, 0.0  ;;  %v266_v19 = vsel %vm181_vm3, %v263_v10, 0.0  ;;  %v280_v20 = vsel %vm181_vm3, %v265_v11, 0.0  ;;  %v298_v51 = vunpack.c.l.s4 %v525_v50 }
  0x1c   :  { %v211_v61 = vmul.f32 1.442695, %v208_v58  ;;  %v207_v62 = vsub.f32 %v593_v26, %v205_v59  ;;  %v273_v25 = vsel %vm181_vm3, %v264_v16, 0.0  ;;  %v267_v27 = vrot.slane %v266_v19, 4 }
  0x1d   :  { %v281_v28 = vrot.slane %v280_v20, 4  ;;  %v274_v33 = vrot.slane %v273_v25, 4 }
  0x1e   :  { %466 = vpow2.f32 %v211_v61  ;;  %v209_v63 = vmul.f32 1.442695, %v207_v62  ;;  %v268_v36 = vadd.f32 %v267_v27, %v266_v19 }
  0x1f   :  { %v282_v37 = vadd.f32 %v281_v28, %v280_v20  ;;  %v275_v40 = vadd.f32 %v274_v33, %v273_v25 }
  0x20   :  { %468 = vpow2.f32 %v209_v63  ;;  %v269_v43 = vrot.slane %v268_v36, 2  ;;  %v299_v63 = vunpack.c.0.s8 %v298_v51 }
  0x21   :  { %v283_v44 = vrot.slane %v282_v37, 2  ;;  %v276_v46 = vrot.slane %v275_v40, 2 }
  0x22   :  { %v270_v47 = vadd.f32 %v269_v43, %v268_v36 }
  0x23   :  { %v284_v48 = vadd.f32 %v283_v44, %v282_v37  ;;  %v277_v49 = vadd.f32 %v276_v46, %v275_v40 }
  0x24   :  { %v271_v57 = vrot.slane %v270_v47, 1 }
  0x25   :  { %v285_v58 = vrot.slane %v284_v48, 1  ;;  %v278_v61 = vrot.slane %v277_v49, 1 }
  0x26   :  { %v272_v5 = vadd.f32 %v271_v57, %v270_v47 }
  0x27   :  { %v279_v10 = vadd.f32 %v278_v61, %v277_v49 }
  0x28   :  { %v467_v6 = vpop.eup %466 }
  0x29   :  { %v230_v7 = vsel %vm181_vm3, %v467_v6, 0.0  ;;  %v286_v6 = vadd.f32 %v285_v58, %v284_v48 }
  0x2a   :  { %v231_v9 = vrot.slane %v230_v7, 4  ;;  %v469_v12 = vpop.eup %468 }
  0x2b   :  { %v214_v13 = vcombine.high %v469_v12, %v469_v12  ;;  %v216_v14 = vsel %vm181_vm3, %v469_v12, 0.0 }
  0x2c   :  { %v232_v15 = vadd.f32 %v231_v9, %v230_v7  ;;  %v217_v17 = vrot.slane %v216_v14, 4 }
  0x2d   :  { %v223_v21 = vsel %vm181_vm3, %v214_v13, 0.0 }
  0x2e   :  { %v233_v22 = vrot.slane %v232_v15, 2  ;;  %v218_v23 = vadd.f32 %v217_v17, %v216_v14  ;;  %v224_v24 = vrot.slane %v223_v21, 4  ;;  %v302_v14 = vsub.s32 %v299_v63, %v620_v60 }
  0x30   :  { %v234_v26 = vadd.f32 %v233_v22, %v232_v15  ;;  %v219_v29 = vrot.slane %v218_v23, 2  ;;  %v225_v31 = vadd.f32 %v224_v24, %v223_v21 }
  0x32   :  { %v235_v32 = vrot.slane %v234_v26, 1  ;;  %v220_v30 = vadd.f32 %v219_v29, %v218_v23  ;;  %v226_v34 = vrot.slane %v225_v31, 2 }
  0x34   :  { %v236_v35 = vadd.f32 %v235_v32, %v234_v26  ;;  %v221_v38 = vrot.slane %v220_v30, 1  ;;  %v227_v39 = vadd.f32 %v226_v34, %v225_v31 }
  0x36   :  { %470 = vlog2.f32 %v236_v35  ;;  %v222_v41 = vadd.f32 %v221_v38, %v220_v30  ;;  %v228_v42 = vrot.slane %v227_v39, 1 }
  0x38   :  { %v229_v45 = vadd.f32 %v228_v42, %v227_v39  ;;  %472 = vlog2.f32 %v222_v41 }
  0x3a   :  { %474 = vlog2.f32 %v229_v45 }
  0x40   :  { %v471_v53 = vpop.eup %470 }
  0x41   :  { %v242_v59 = vmul.f32 0.6931472, %v471_v53 }
  0x42   :  { %v473_v62 = vpop.eup %472 }
  0x43   :  { %v238_v3 = vmul.f32 0.6931472, %v473_v62  ;;  %v245_v4 = vadd.f32 %v242_v59, %v609_v54  ;;  %v292_v54 = vld [vmem:[#allocation2] sm:$0x7] }
  0x44   :  { %v475_v7 = vpop.eup %474 }
  0x45   :  { %v240_v8 = vmul.f32 0.6931472, %v475_v7  ;;  %v243_v9 = vadd.f32 %v238_v3, %v607_v52  ;;  %v289_v13 = vsub.f32 %v245_v4, %v286_v6  ;;  %v368_v52 = vld [vmem:[#allocation3] sm:$0x7] }
  0x46   :  { %v377_v24 = vrot.slane %v368_v52, %v632_v2  ;;  %v381_v25 = vrot.slane %v368_v52, %v629_v1 }
  0x47   :  { %v244_v11 = vadd.f32 %v240_v8, %v613_v56  ;;  %v287_v12 = vsub.f32 %v243_v9, %v272_v5  ;;  %v310_v17 = vrot.slane %v289_v13, %v302_v14  ;;  %v373_v56 = vrot.slane %v368_v52, %v626_v0 }
  0x48   :  { %v386_v29 = vsel %vm350_vm10, %v377_v24, 0.0  ;;  %v388_v34 = vsel %vm350_vm10, %v381_v25, 0.0 }
  0x49   :  { %v288_v15 = vsub.f32 %v244_v11, %v279_v10  ;;  %v385_v26 = vsel %vm350_vm10, %v373_v56, 0.0 }
  0x4a   :  { %v387_v30 = vadd.f32 %v386_v29, %v385_v26 }
  0x4b   :  { %v296_v16 = vcombine.low %v287_v12, %v288_v15 }
  0x4c   :  { %v389_v36 = vadd.f32 %v388_v34, %v387_v30 }
  0x4d   :  { %v303_v19 = vrot.slane %v296_v16, %v302_v14 }
  0x4f   :  { %v311_v20 = vcombine.low %v303_v19, %v310_v17 }
  0x51   :  { %v318_v21 = vrot.slane %v311_v20, %v302_v14 }
  0x53   :  { %v320_v22 = vmul.f32 %v611_v55, %v318_v21 }
  0x55   :  { %v321_v23 = vadd.f32 %v320_v22, %v292_v54 }
  0x57   :  { %326 = vst.msk [vmem:[#allocation2] sm:$0x7] %vm585_vm1, %v321_v23 }
  0x5e   :  { %v333_v60 = vld [vmem:[#allocation2] sm:$0x7] }
  0x5f   :  { %v338_v27 = vrot.slane %v333_v60, %v626_v0  ;;  %v342_v28 = vrot.slane %v333_v60, %v632_v2  ;;  %v346_v55 = vrot.slane %v333_v60, %v629_v1 }
  0x61   :  { %v351_v31 = vsel %vm350_vm10, %v338_v27, 0.0  ;;  %v352_v18 = vsel %vm350_vm10, %v342_v28, 0.0  ;;  %v354_v32 = vsel %vm350_vm10, %v346_v55, 0.0 }
  0x62   :  { %v353_v33 = vadd.f32 %v352_v18, %v351_v31 }
  0x64   :  { %v355_v35 = vadd.f32 %v354_v32, %v353_v33 }
  0x66   :  { %356 = vadd.xlane.f32.xlu0 %v355_v35 }
  0x6a   :  { %390 = vadd.xlane.f32.xlu0 %v389_v36 }
  0xf3   :  { %v357_v37 = vpop.xlane.xlu0 %356 }
  0xf4   :  { %v358_v38 = vrot.slane %v357_v37, 4 }
  0xf6   :  { %v359_v39 = vadd.f32 %v358_v38, %v357_v37 }
  0xf7   :  { %v391_v40 = vpop.xlane.xlu0 %390 }
  0xf8   :  { %v360_v0 = vrot.slane %v359_v39, 2  ;;  %v392_v41 = vrot.slane %v391_v40, 4 }
  0xfa   :  { %v393_v2 = vadd.f32 %v392_v41, %v391_v40  ;;  %v361_v42 = vadd.f32 %v360_v0, %v359_v39 }
  0xfc   :  { %v394_v1 = vrot.slane %v393_v2, 2  ;;  %v362_v43 = vrot.slane %v361_v42, 1 }
  0xfe   :  { %v395_v44 = vadd.f32 %v394_v1, %v393_v2  ;;  %v363_v45 = vadd.f32 %v362_v43, %v361_v42 }
 0x100   :  { %457 = vpush %v363_v45  ;;  %v396_v46 = vrot.slane %v395_v44, 1 }
 0x102   :  { %v397_v47 = vadd.f32 %v396_v46, %v395_v44 }
 0x104   :  { %459 = vpush %v397_v47 }
 0x131   :  { %s458_s9 = spop %457 }
 0x132   :  { %v365_v48 = vstv %s458_s9 }
 0x133   :  { %367 = vst.msk [vmem:[#allocation9] sm:$0x1] %vm366_vm11, %v365_v48 }
 0x134   :  { %487 = shalt.err (!%p484_p4)
}
 0x135   :  { %s488_s16 = scalar_lea.hbm %s698_s4, 16 }
 0x136   :  { %p489_p5 = scmp.ne.s32.totalorder %s698_s4, %s488_s16  ;;  %p492_p6 = scmp.lt.u32.totalorder %s488_s16, %s698_s4 }
 0x138   :  { %p494_p7 = pnand %p492_p6, %p489_p5 }
 0x13a   :  { %497 = shalt.err (!%p494_p7)
}
 0x13b   :  { %410 = dma.vmem_to_hbm [thread:$0]  %s408_s2, 16, %s698_s4, [#allocation10]  }
 0x13c   :  { %s460_s23 = spop %459  ;;  %s498_s24 = scalar_lea.vmem %s418_s11, 16 }
 0x13d   :  { %v399_v49 = vstv %s460_s23  ;;  %p499_p8 = scmp.ne.s32.totalorder %s418_s11, %s498_s24  ;;  %s502_s25 = scalar_lea.vmem %s418_s11, 32 }
 0x13e   :  { %400 = vst.msk [vmem:[#allocation11] sm:$0x1] %vm366_vm11, %v399_v49  ;;  %p503_p9 = scmp.lt.s32.totalorder %s418_s11, %s418_s11  ;;  %p504_p10 = scmp.lt.s32.totalorder %s502_s25, %s498_s24 }
 0x140   :  { %p505_p11 = por %p504_p10, %p503_p9 }
 0x142   :  { %p506_p12 = pnand %p505_p11, %p499_p8 }
 0x144   :  { %509 = shalt.err (!%p506_p12)
}
 0x145   :  { %s510_s3 = scalar_lea.hbm %s699_s5, 16 }
 0x146   :  { %p511_p13 = scmp.ne.s32.totalorder %s699_s5, %s510_s3  ;;  %p514_p0 = scmp.lt.u32.totalorder %s510_s3, %s699_s5 }
 0x148   :  { %p516_p1 = pnand %p514_p0, %p511_p13 }
 0x14a   :  { %519 = shalt.err (!%p516_p1)
}
 0x14b   :  { %420 = dma.vmem_to_hbm [thread:$0]  %s418_s11, 16, %s699_s5, [#allocation12]  }
 0x14c   :  { %520 = dma.done.wait [#allocation10], 16  }
 0x14d   :  { %521 = vsyncadd [#allocation10], 4294967280 }
 0x14e   :  { %522 = dma.done.wait [#allocation12], 16  }
 0x14f   :  { %523 = vsyncadd [#allocation12], 4294967280 }
 0x150   :  { %427 = vsyncpa [#allocation10], 1 }
 0x151   :  { %428 = vsyncpa [#allocation12], 1 }

</bundles_post_ra>
